<compile_context>
chip_gen: v7x
topology: tpu7x:2x2x1
jax: 0.10.0
libtpu: 0.0.40
codegen_flags: <defaults>
</compile_context>

<pallas_src>
import functools

import jax
import jax.numpy as jnp
from jax import lax
from jax.experimental import pallas as pl
from jax.experimental.pallas import tpu as pltpu


def _focal_loss_kernel(x_ref, t_ref, alpha_ref, out_ref, *,
                       gamma, n_total, tile_n, tiles_per_slice):
    p = pl.program_id(0)          # parallel slice (TensorCore shard on v7x)
    j = pl.program_id(1)          # row-tile index within the slice

    x = x_ref[...].astype(jnp.float32)       # (TN, C) logits, f32 compute
    t = t_ref[...]                           # (TN, 1) int32 targets
    alpha = alpha_ref[...]                   # (1, C)  per-class weights
    tn, c = x.shape

    # target-class mask via iota compare (vectorized gather of target column)
    class_ids = lax.broadcasted_iota(jnp.int32, (tn, c), 1)
    mask = class_ids == t                    # (TN, C) bool

    # numerically-stable log-softmax, evaluated only at the target column
    m = jnp.max(x, axis=-1, keepdims=True)                           # (TN, 1)
    lse = m + jnp.log(jnp.sum(jnp.exp(x - m), axis=-1, keepdims=True))
    x_t = jnp.sum(jnp.where(mask, x, 0.0), axis=-1, keepdims=True)   # (TN, 1)
    logp_t = x_t - lse

    # weighted cross entropy (F.cross_entropy, reduction='none', weight=alpha)
    w_t = jnp.sum(jnp.where(mask, alpha, 0.0), axis=-1, keepdims=True)
    ce = -w_t * logp_t                                               # (TN, 1)

    # focal modulation; integer gamma avoids the exp(gamma*log(.)) EUP path
    pt = jnp.exp(-ce)
    one_minus_pt = jnp.maximum(1.0 - pt, 0.0)
    if float(gamma) == int(gamma):          # trace-time choice (gamma is static)
        mod = lax.integer_pow(one_minus_pt, int(gamma))
    else:
        mod = jnp.power(one_minus_pt, gamma)
    focal = mod * ce                                                 # (TN, 1)

    # mask rows beyond the true N (partial last tile / clamped padding tiles)
    row0 = (p * tiles_per_slice + j) * tile_n
    global_row = row0 + lax.broadcasted_iota(jnp.int32, (tn, 1), 0)
    focal = jnp.where(global_row < n_total, focal, 0.0)
    partial = jnp.sum(focal)

    # SMEM scalar accumulator: same output block across the 'arbitrary' axis
    @pl.when(j == 0)
    def _():
        out_ref[0, 0] = 0.0
    out_ref[0, 0] += partial


def focal_loss(inputs, targets, alpha=None, gamma=2.0, reduction="mean",
               tile_n=512, num_cores=2):
    """inputs: (N, C) logits (any float dtype; not upcast at the call site);
    targets: (N,) int class indices; alpha: optional (C,) per-class weights."""
    # TODO(synk): reduction='none' (per-sample output) path not wired up.
    assert reduction in ("mean", "sum")
    n, c = inputs.shape

    if alpha is None:
        alpha = jnp.ones((c,), jnp.float32)
    alpha2d = jnp.asarray(alpha, jnp.float32).reshape(1, c)
    t2d = targets.astype(jnp.int32).reshape(n, 1)

    # Tile sizing: ~2 (double-buffer) * tile_n * C * itemsize must stay well
    # under the scoped VMEM limit (16 MiB v5e, 32 MiB v6e/v7x default; only
    # 64 MiB physical on v7x) -- shrink tile_n or raise
    # pltpu.CompilerParams(vmem_limit_bytes=...) for very large C.
    tile_n = max(8, -(-int(tile_n) // 8) * 8)      # sublane multiple
    tile_n = min(tile_n, -(-n // 8) * 8)           # no bigger than needed
    tiles_total = -(-n // tile_n)
    num_slices = max(1, min(int(num_cores), tiles_total))
    tiles_per_slice = -(-tiles_total // num_slices)
    needs_clamp = num_slices * tiles_per_slice != tiles_total

    def tile_index(p, j):
        idx = p * tiles_per_slice + j
        if needs_clamp:
            # fully-padded trailing tiles re-read the last real tile; their
            # rows are masked out inside the kernel.
            idx = jnp.minimum(idx, tiles_total - 1)
        return idx

    kernel = functools.partial(
        _focal_loss_kernel, gamma=float(gamma), n_total=n,
        tile_n=tile_n, tiles_per_slice=tiles_per_slice)

    partials = pl.pallas_call(
        kernel,
        out_shape=jax.ShapeDtypeStruct((num_slices, 1), jnp.float32),
        grid=(num_slices, tiles_per_slice),
        in_specs=[
            pl.BlockSpec((tile_n, c), lambda p, j: (tile_index(p, j), 0)),
            pl.BlockSpec((tile_n, 1), lambda p, j: (tile_index(p, j), 0)),
            pl.BlockSpec((1, c), lambda p, j: (0, 0)),  # alpha stays resident
        ],
        out_specs=pl.BlockSpec((1, 1), lambda p, j: (p, 0),
                               memory_space=pltpu.MemorySpace.SMEM),
        compiler_params=pltpu.CompilerParams(
            dimension_semantics=("parallel", "arbitrary")),
    )(inputs, t2d, alpha2d)

    total = jnp.sum(partials)
    if reduction == "mean":
        return total / n
    return total


def _focal_loss_ref(inputs, targets, alpha, gamma, reduction="mean"):
    x = inputs.astype(jnp.float32)
    logp = jax.nn.log_softmax(x, axis=-1)
    logp_t = jnp.take_along_axis(logp, targets[:, None], axis=-1)[:, 0]
    w_t = alpha[targets]
    ce = -w_t * logp_t
    pt = jnp.exp(-ce)
    focal = (1.0 - pt) ** gamma * ce
    return jnp.mean(focal) if reduction == "mean" else jnp.sum(focal)


if __name__ == "__main__":
    key = jax.random.PRNGKey(0)
    k1, k2, k3, k4 = jax.random.split(key, 4)

    # Small case: f32 logits, per-class alpha, mean reduction.
    N, C = 8, 16
    x = jax.random.normal(k1, (N, C), jnp.float32)
    tgt = jax.random.randint(k2, (N,), 0, C, jnp.int32)
    alpha = jnp.linspace(0.5, 1.5, C, dtype=jnp.float32)
    out = focal_loss(x, tgt, alpha=alpha, gamma=2.0, reduction="mean")
    out = jax.block_until_ready(out)
    ref = _focal_loss_ref(x, tgt, alpha, 2.0, reduction="mean")
    assert jnp.allclose(out, ref, rtol=1e-5, atol=1e-6), (out, ref)

    # Larger case: bf16 logits (no wrapper upcast), exercises row tiling,
    # the parallel slice axis, ragged-last-tile masking and the clamped
    # fully-padded tile (tiles_total=5 -> 2 slices x 3 tiles), sum reduction.
    N2, C2 = 300, 128
    x2 = jax.random.normal(k3, (N2, C2), jnp.bfloat16)
    tgt2 = jax.random.randint(k4, (N2,), 0, C2, jnp.int32)
    out2 = focal_loss(x2, tgt2, alpha=None, gamma=2.0, reduction="sum",
                      tile_n=64)
    out2 = jax.block_until_ready(out2)
    ref2 = _focal_loss_ref(x2, tgt2, jnp.ones((C2,), jnp.float32), 2.0,
                           reduction="sum")
    assert jnp.allclose(out2, ref2, rtol=1e-4, atol=1e-3), (out2, ref2)

    print("KERNEL_OK")
</pallas_src>

<mosaic_0001>
module attributes {stable_mosaic.version = 11 : i64} {
  func.func @_focal_loss_kernel(%arg0: i32, %arg1: i32, %arg2: memref<8x16xf32, #tpu.memory_space<vmem>>, %arg3: memref<8x1xi32, #tpu.memory_space<vmem>>, %arg4: memref<1x16xf32, #tpu.memory_space<vmem>>, %arg5: memref<1x1xf32, #tpu.memory_space<smem>>) attributes {dimension_semantics = [#tpu.dimension_semantics<parallel>, #tpu.dimension_semantics<arbitrary>], iteration_bounds = array<i64: 1, 1>, scalar_prefetch = 0 : i64, scratch_operands = 0 : i64, tpu.core_type = #tpu.core_type<tc>, window_params = [{transform_indices = @transform_0, window_bounds = array<i64: 8, 16>}, {transform_indices = @transform_1, window_bounds = array<i64: 8, 1>}, {pipeline_mode = #tpu.pipeline_mode<synchronous>, transform_indices = @transform_2, window_bounds = array<i64: 1, 16>}, {transform_indices = @transform_3, window_bounds = array<i64: 1, 1>}]} {
    %c0 = arith.constant 0 : index
    %c0_0 = arith.constant 0 : index
    %0 = vector.load %arg2[%c0, %c0_0] : memref<8x16xf32, #tpu.memory_space<vmem>>, vector<8x16xf32>
    %c0_1 = arith.constant 0 : index
    %c0_2 = arith.constant 0 : index
    %1 = vector.load %arg3[%c0_1, %c0_2] : memref<8x1xi32, #tpu.memory_space<vmem>>, vector<8x1xi32>
    %c0_3 = arith.constant 0 : index
    %c0_4 = arith.constant 0 : index
    %2 = vector.load %arg4[%c0_3, %c0_4] : memref<1x16xf32, #tpu.memory_space<vmem>>, vector<1x16xf32>
    %3 = tpu.iota {dimensions = array<i32: 1>} : vector<8x16xi32>
    %4 = vector.broadcast %1 : vector<8x1xi32> to vector<8x16xi32>
    %5 = arith.cmpi eq, %3, %4 : vector<8x16xi32>
    %cst = arith.constant dense<0xFF800000> : vector<8xf32>
    %6 = vector.multi_reduction <maximumf>, %0, %cst [1] : vector<8x16xf32> to vector<8xf32>
    %7 = vector.shape_cast %6 : vector<8xf32> to vector<8x1xf32>
    %8 = vector.broadcast %7 : vector<8x1xf32> to vector<8x16xf32>
    %9 = arith.subf %0, %8 : vector<8x16xf32>
    %10 = math.exp %9 : vector<8x16xf32>
    %cst_5 = arith.constant dense<0.000000e+00> : vector<8xf32>
    %11 = vector.multi_reduction <add>, %10, %cst_5 [1] : vector<8x16xf32> to vector<8xf32>
    %12 = vector.shape_cast %11 : vector<8xf32> to vector<8x1xf32>
    %13 = math.log %12 : vector<8x1xf32>
    %14 = arith.addf %7, %13 : vector<8x1xf32>
    %cst_6 = arith.constant 0.000000e+00 : f32
    %15 = vector.broadcast %cst_6 : f32 to vector<8x16xf32>
    %16 = arith.select %5, %0, %15 : vector<8x16xi1>, vector<8x16xf32>
    %cst_7 = arith.constant dense<0.000000e+00> : vector<8xf32>
    %17 = vector.multi_reduction <add>, %16, %cst_7 [1] : vector<8x16xf32> to vector<8xf32>
    %18 = vector.shape_cast %17 : vector<8xf32> to vector<8x1xf32>
    %19 = arith.subf %18, %14 : vector<8x1xf32>
    %cst_8 = arith.constant 0.000000e+00 : f32
    %20 = vector.shape_cast %2 : vector<1x16xf32> to vector<1x16xf32>
    %21 = vector.broadcast %20 : vector<1x16xf32> to vector<8x16xf32>
    %22 = vector.broadcast %cst_8 : f32 to vector<8x16xf32>
    %23 = arith.select %5, %21, %22 : vector<8x16xi1>, vector<8x16xf32>
    %cst_9 = arith.constant dense<0.000000e+00> : vector<8xf32>
    %24 = vector.multi_reduction <add>, %23, %cst_9 [1] : vector<8x16xf32> to vector<8xf32>
    %25 = vector.shape_cast %24 : vector<8xf32> to vector<8x1xf32>
    %cst_10 = arith.constant 0.000000e+00 : f32
    %26 = vector.broadcast %cst_10 : f32 to vector<8x1xf32>
    %27 = arith.subf %26, %25 : vector<8x1xf32>
    %28 = arith.mulf %27, %19 : vector<8x1xf32>
    %cst_11 = arith.constant 0.000000e+00 : f32
    %29 = vector.broadcast %cst_11 : f32 to vector<8x1xf32>
    %30 = arith.subf %29, %28 : vector<8x1xf32>
    %31 = math.exp %30 : vector<8x1xf32>
    %cst_12 = arith.constant 1.000000e+00 : f32
    %32 = vector.broadcast %cst_12 : f32 to vector<8x1xf32>
    %33 = arith.subf %32, %31 : vector<8x1xf32>
    %cst_13 = arith.constant 0.000000e+00 : f32
    %34 = vector.broadcast %cst_13 : f32 to vector<8x1xf32>
    %35 = arith.maximumf %33, %34 : vector<8x1xf32>
    %36 = arith.mulf %35, %35 : vector<8x1xf32>
    %37 = arith.mulf %36, %28 : vector<8x1xf32>
    %c1_i32 = arith.constant 1 : i32
    %38 = arith.muli %arg0, %c1_i32 : i32
    %39 = arith.addi %38, %arg1 : i32
    %c8_i32 = arith.constant 8 : i32
    %40 = arith.muli %39, %c8_i32 : i32
    %41 = tpu.iota {dimensions = array<i32: 0>} : vector<8x1xi32>
    %42 = vector.broadcast %40 : i32 to vector<8x1xi32>
    %43 = arith.addi %42, %41 : vector<8x1xi32>
    %c8_i32_14 = arith.constant 8 : i32
    %44 = vector.broadcast %c8_i32_14 : i32 to vector<8x1xi32>
    %45 = arith.cmpi slt, %43, %44 : vector<8x1xi32>
    %cst_15 = arith.constant 0.000000e+00 : f32
    %46 = vector.broadcast %cst_15 : f32 to vector<8x1xf32>
    %47 = arith.select %45, %37, %46 : vector<8x1xi1>, vector<8x1xf32>
    %48 = vector.shape_cast %47 : vector<8x1xf32> to vector<1x8x1xf32>
    %cst_16 = arith.constant dense<0.000000e+00> : vector<1xf32>
    %49 = vector.multi_reduction <add>, %48, %cst_16 [1, 2] : vector<1x8x1xf32> to vector<1xf32>
    %50 = vector.shape_cast %49 : vector<1xf32> to vector<1x1x1xf32>
    %51 = vector.extract %50[0, 0, 0] : f32 from vector<1x1x1xf32>
    %c0_i32 = arith.constant 0 : i32
    %52 = arith.cmpi eq, %arg1, %c0_i32 : i32
    %53 = arith.extui %52 : i1 to i32
    %c0_i32_17 = arith.constant 0 : i32
    %54 = arith.cmpi ne, %53, %c0_i32_17 : i32
    scf.if %54 {
      %cst_22 = arith.constant 0.000000e+00 : f32
      %c0_23 = arith.constant 0 : index
      %c0_24 = arith.constant 0 : index
      %58 = memref.load %arg5[%c0_23, %c0_24] : memref<1x1xf32, #tpu.memory_space<smem>>
      memref.store %cst_22, %arg5[%c0_23, %c0_24] : memref<1x1xf32, #tpu.memory_space<smem>>
    } else {
    }
    %c0_18 = arith.constant 0 : index
    %c0_19 = arith.constant 0 : index
    %55 = memref.load %arg5[%c0_18, %c0_19] : memref<1x1xf32, #tpu.memory_space<smem>>
    %56 = arith.addf %55, %51 : f32
    %c0_20 = arith.constant 0 : index
    %c0_21 = arith.constant 0 : index
    %57 = memref.load %arg5[%c0_20, %c0_21] : memref<1x1xf32, #tpu.memory_space<smem>>
    memref.store %56, %arg5[%c0_20, %c0_21] : memref<1x1xf32, #tpu.memory_space<smem>>
    return
  }
  func.func @transform_0(%arg0: i32, %arg1: i32) -> (i32, i32) {
    %c1_i32 = arith.constant 1 : i32
    %0 = arith.muli %arg0, %c1_i32 : i32
    %1 = arith.addi %0, %arg1 : i32
    %c0_i32 = arith.constant 0 : i32
    %c0_i32_0 = arith.constant 0 : i32
    return %1, %c0_i32 : i32, i32
  }
  func.func @transform_1(%arg0: i32, %arg1: i32) -> (i32, i32) {
    %c1_i32 = arith.constant 1 : i32
    %0 = arith.muli %arg0, %c1_i32 : i32
    %1 = arith.addi %0, %arg1 : i32
    %c0_i32 = arith.constant 0 : i32
    %c0_i32_0 = arith.constant 0 : i32
    return %1, %c0_i32 : i32, i32
  }
  func.func @transform_2(%arg0: i32, %arg1: i32) -> (i32, i32) {
    %c0_i32 = arith.constant 0 : i32
    %c0_i32_0 = arith.constant 0 : i32
    %c0_i32_1 = arith.constant 0 : i32
    return %c0_i32, %c0_i32_0 : i32, i32
  }
  func.func @transform_3(%arg0: i32, %arg1: i32) -> (i32, i32) {
    %c0_i32 = arith.constant 0 : i32
    %c0_i32_0 = arith.constant 0 : i32
    return %arg0, %c0_i32 : i32, i32
  }
}

</mosaic_0001>

<bundles_post_ra>
// kernel: tpu_custom_call.1
= control target key start
LH: loop header
LB: loop body
LE: loop exit
PB: predicated region body
PF: predicated region fallthrough
CT: control target
= control target key end

     0   :  { %vm58_vm0 = vcmask 130048   ;;  %s221_s0 = inlined_call_operand.vmem [shape: f32[8,16], index: 0, kind: input, shape index: {}]   ;;  %s222_s1 = inlined_call_operand.vmem [shape: s32[8,1], index: 1, kind: input, shape index: {}]   ;;  %s223_s2 = inlined_call_operand.vmem [shape: f32[1,16], index: 2, kind: input, shape index: {}]   ;;  %s224_s3 = inlined_call_operand.hbm [shape: f32[1,1], index: 3, kind: output, shape index: {}]  }
   0x1   :  { %v49_v0 = vld [vmem:[%s221_s0] sm:$0xff] }
   0x2   :  { %8 = vsyncpa [#allocation3], 0  ;;  %v59_v1 = vsel %vm58_vm0, %v49_v0, -inf  ;;  %v174_v2 = vmov 0   ;;  %v50_v3 = vld [vmem:[%s222_s1] sm:$0xff]  ;;  %v52_v7 = vlaneseq  ;;  %vm103_vm2 = vcmask 7168  }
   0x3   :  { %155 = vset.pattern.permute.xlu0 %v174_v2  ;;  %v149_v13 = vld [vmem:[%s223_s2] ss:$0 sm:$0xff]  ;;  %s162_s18 = scalar_lea.hbm %s224_s3, 16 }
   0x4   :  { %60 = vmax.xlane.f32.xlu0 %v59_v1  ;;  %v53_v8 = vand.u32 127, %v52_v7  ;;  %p163_p0 = scmp.ne.s32.totalorder %s224_s3, %s162_s18  ;;  %p166_p1 = scmp.lt.u32.totalorder %s162_s18, %s224_s3 }
   0x6   :  { %p168_p2 = pnand %p166_p1, %p163_p0 }
  0x1a   :  { %55 = vperm.xlu0 %155, %v50_v3  }
  0x91   :  { %v61_v4 = vpop.xlane.xlu0 %60 }
  0x92   :  { %v62_v5 = vsub.f32 %v49_v0, %v61_v4 }
  0x94   :  { %v63_v6 = vmul.f32 1.442695, %v62_v5 }
  0x96   :  { %156 = vpow2.f32 %v63_v6 }
  0x99   :  { %v56_v9 = vpop.permute.xlu0 %55 }
  0x9a   :  { %vm57_vm1 = vcmp.eq.s32.totalorder %v53_v8, %v56_v9 }
  0x9b   :  { %v71_v11 = vsel %vm57_vm1, %v49_v0, 0.0  ;;  %v82_v15 = vsel %vm57_vm1, %v149_v13, 0.0 }
  0x9c   :  { %v72_v14 = vsel %vm58_vm0, %v71_v11, 0.0  ;;  %v83_v16 = vsel %vm58_vm0, %v82_v15, 0.0 }
  0xa0   :  { %v157_v10 = vpop.eup %156 }
  0xa1   :  { %v65_v12 = vsel %vm58_vm0, %v157_v10, 0.0 }
  0xa2   :  { %66 = vadd.xlane.f32.xlu1 %v65_v12 }
  0xa6   :  { %73 = vadd.xlane.f32.xlu1 %v72_v14 }
  0xaa   :  { %84 = vadd.xlane.f32.xlu1 %v83_v16 }
 0x12f   :  { %v67_v17 = vpop.xlane.xlu1 %66 }
 0x130   :  { %158 = vlog2.f32 %v67_v17 }
 0x133   :  { %v74_v18 = vpop.xlane.xlu1 %73 }
 0x137   :  { %v85_v21 = vpop.xlane.xlu1 %84 }
 0x138   :  { %v86_v24 = vsub.f32 0.0, %v85_v21 }
 0x13a   :  { %v159_v19 = vpop.eup %158 }
 0x13b   :  { %v69_v20 = vmul.f32 0.6931472, %v159_v19 }
 0x13d   :  { %v70_v22 = vadd.f32 %v69_v20, %v61_v4 }
 0x13f   :  { %v75_v23 = vsub.f32 %v74_v18, %v70_v22 }
 0x141   :  { %v87_v25 = vmul.f32 %v86_v24, %v75_v23 }
 0x143   :  { %v88_v26 = vsub.f32 0.0, %v87_v25 }
 0x145   :  { %v89_v27 = vmul.f32 1.442695, %v88_v26 }
 0x147   :  { %160 = vpow2.f32 %v89_v27 }
 0x151   :  { %v161_v28 = vpop.eup %160 }
 0x152   :  { %v91_v29 = vsub.f32 1.0, %v161_v28 }
 0x154   :  { %v92_v30 = vmax.f32 %v91_v29, 0.0 }
 0x156   :  { %v93_v31 = vmul.f32 %v92_v30, %v92_v30 }
 0x158   :  { %v94_v32 = vmul.f32 %v93_v31, %v87_v25 }
 0x15a   :  { %v104_v33 = vsel %vm103_vm2, %v94_v32, 0.0 }
 0x15b   :  { %105 = vadd.xlane.f32.xlu1 %v104_v33 }
 0x1e8   :  { %v106_v34 = vpop.xlane.xlu1 %105 }
 0x1e9   :  { %v107_v35 = vrot.slane %v106_v34, 4 }
 0x1eb   :  { %v108_v36 = vadd.f32 %v107_v35, %v106_v34 }
 0x1ed   :  { %v109_v37 = vrot.slane %v108_v36, 2 }
 0x1ef   :  { %v110_v38 = vadd.f32 %v109_v37, %v108_v36 }
 0x1f1   :  { %v111_v39 = vrot.slane %v110_v38, 1 }
 0x1f3   :  { %v112_v40 = vadd.f32 %v111_v39, %v110_v38 }
 0x1f5   :  { %150 = vpush %v112_v40 }
 0x226   :  { %s151_s1 = spop %150 }
 0x227   :  { %123 = sst [smem:[#allocation2]] %s151_s1 }
 0x228   :  { %171 = shalt.err (!%p168_p2)
}
 0x229   :  { %s175_s23 = smov [#allocation2]  }
 0x22a   :  { %131 = dma.smem_to_hbm %s175_s23, 16, %s224_s3, [#allocation3]  }
 0x22b   :  { %172 = dma.done.wait [#allocation3], 16  }
 0x22c   :  { %173 = vsyncadd [#allocation3], 4294967280 }
 0x22d   :  { %135 = sfence }
 0x22e   :  { %136 = vsyncpa [#allocation3], 1 }

</bundles_post_ra>
